<compile_context>
chip_gen: v7x
topology: tpu7x:2x2x1
jax: 0.10.0
libtpu: 0.0.40
codegen_flags: <defaults>
</compile_context>

<pallas_src>
import functools
import math

import jax
import jax.numpy as jnp
from jax.experimental import pallas as pl
from jax.experimental.pallas import tpu as pltpu

# ---- small shapes consistent with the module ----
B = 2          # batch
S = 8          # sequence length
D_MODEL = 32   # config.D_MODEL
VOCAB = 512    # vocab size (table stays in HBM, so this can grow arbitrarily)


def _gather_embed_kernel(ids_ref, table_hbm, out_ref, rows_vmem, copy_sems,
                         *, tokens_per_tile, scale):
    # ids_ref:   (N_pad,) int32 in SMEM (scalar prefetch)
    # table_hbm: (V, D) raw HBM ref (memory_space=pl.ANY)
    # out_ref:   (tokens_per_tile, D) VMEM output block
    # rows_vmem: (tokens_per_tile, D) VMEM staging buffer
    # copy_sems: (tokens_per_tile,) DMA semaphores
    t0 = pl.program_id(0) * tokens_per_tile
    vocab = table_hbm.shape[0]

    # Issue all row gathers for this tile (they overlap each other), then wait.
    copies = []
    for i in range(tokens_per_tile):
        row = ids_ref[t0 + i]
        # Clamp like jnp.take (reference semantics) instead of faulting / zeroing.
        row = jnp.where(row < 0, 0, row)
        row = jnp.where(row >= vocab, vocab - 1, row)
        cp = pltpu.make_async_copy(
            table_hbm.at[pl.ds(row, 1), :],
            rows_vmem.at[pl.ds(i, 1), :],
            copy_sems.at[i],
        )
        cp.start()
        copies.append(cp)
    for cp in copies:
        cp.wait()

    # * sqrt(d_model): single fused VPU multiply on the gathered rows.
    out_ref[...] = (rows_vmem[...] * jnp.float32(scale)).astype(out_ref.dtype)


def input_embeddings(token_ids, embedding_table, *, tokens_per_tile=8):
    """token_ids: (B, S) int, embedding_table: (V, D) f32 -> (B, S, D) f32."""
    b, s = token_ids.shape
    v, d = embedding_table.shape
    n = b * s
    tn = min(tokens_per_tile, n)
    n_pad = pl.cdiv(n, tn) * tn

    ids_flat = token_ids.reshape(n).astype(jnp.int32)
    if n_pad != n:
        ids_flat = jnp.concatenate(
            [ids_flat, jnp.zeros((n_pad - n,), dtype=jnp.int32)])

    kernel = functools.partial(
        _gather_embed_kernel, tokens_per_tile=tn, scale=math.sqrt(d))

    out_flat = pl.pallas_call(
        kernel,
        out_shape=jax.ShapeDtypeStruct((n_pad, d), embedding_table.dtype),
        grid_spec=pltpu.PrefetchScalarGridSpec(
            num_scalar_prefetch=1,                       # ids -> SMEM
            grid=(n_pad // tn,),                         # token tiles (>= 2 steps)
            in_specs=[
                pl.BlockSpec(memory_space=pl.ANY),       # table stays in HBM
            ],
            out_specs=pl.BlockSpec((tn, d), lambda i, ids: (i, 0)),
            scratch_shapes=[
                pltpu.VMEM((tn, d), embedding_table.dtype),  # row staging
                pltpu.SemaphoreType.DMA((tn,)),              # one sem per row DMA
            ],
        ),
        compiler_params=pltpu.CompilerParams(
            dimension_semantics=("parallel",)),          # lets v7x use both TCs
    )(ids_flat, embedding_table)

    return out_flat[:n].reshape(b, s, d)


if __name__ == "__main__":
    key = jax.random.PRNGKey(0)
    k_tab, k_ids = jax.random.split(key)

    # nn.Embedding weight (f32) -- the gather path is exact in f32, no rounding.
    table = jax.random.normal(k_tab, (VOCAB, D_MODEL), dtype=jnp.float32)
    ids = jax.random.randint(k_ids, (B, S), 0, VOCAB, dtype=jnp.int32)

    out = input_embeddings(ids, table)
    out = jax.block_until_ready(out)

    ref = jnp.take(table, ids, axis=0) * math.sqrt(D_MODEL)
    assert out.shape == (B, S, D_MODEL), out.shape
    assert out.dtype == jnp.float32, out.dtype
    assert jnp.allclose(out, ref, rtol=1e-6, atol=1e-6), \
        float(jnp.max(jnp.abs(out - ref)))

    print("KERNEL_OK")
</pallas_src>

<mosaic_0001>
module attributes {stable_mosaic.version = 11 : i64} {
  func.func @_gather_embed_kernel(%arg0: i32, %arg1: memref<16xi32, #tpu.memory_space<smem>>, %arg2: memref<512x32xf32, #tpu.memory_space<any>>, %arg3: memref<8x32xf32, #tpu.memory_space<vmem>>, %arg4: memref<8x32xf32, #tpu.memory_space<vmem>>, %arg5: memref<8x!tpu.dma_semaphore, #tpu.memory_space<semaphore_mem>>) attributes {dimension_semantics = [#tpu.dimension_semantics<parallel>], iteration_bounds = array<i64: 2>, scalar_prefetch = 1 : i64, scratch_operands = 2 : i64, tpu.core_type = #tpu.core_type<tc>, window_params = [{}, {transform_indices = @transform_1, window_bounds = array<i64: 8, 32>}]} {
    %c8_i32 = arith.constant 8 : i32
    %0 = arith.muli %arg0, %c8_i32 : i32
    %c0_i32 = arith.constant 0 : i32
    %1 = arith.addi %0, %c0_i32 : i32
    %2 = arith.index_cast %1 : i32 to index
    %3 = memref.load %arg1[%2] : memref<16xi32, #tpu.memory_space<smem>>
    %c0_i32_0 = arith.constant 0 : i32
    %4 = arith.cmpi slt, %3, %c0_i32_0 : i32
    %c0_i32_1 = arith.constant 0 : i32
    %5 = arith.select %4, %c0_i32_1, %3 : i32
    %c512_i32 = arith.constant 512 : i32
    %6 = arith.cmpi sge, %5, %c512_i32 : i32
    %c511_i32 = arith.constant 511 : i32
    %7 = arith.select %6, %c511_i32, %5 : i32
    %c0_i32_2 = arith.constant 0 : i32
    %c0_i32_3 = arith.constant 0 : i32
    %8 = tpu.memref_slice %arg2[%7, %c0_i32_3] : memref<512x32xf32, #tpu.memory_space<any>> -> memref<1x32xf32, #tpu.memory_space<any>>
    %c0_i32_4 = arith.constant 0 : i32
    %c0_i32_5 = arith.constant 0 : i32
    %9 = tpu.memref_slice %arg4[%c0_i32_4, %c0_i32_5] : memref<8x32xf32, #tpu.memory_space<vmem>> -> memref<1x32xf32, #tpu.memory_space<vmem>>
    %10 = tpu.memref_slice %arg5[%c0_i32_2] : memref<8x!tpu.dma_semaphore, #tpu.memory_space<semaphore_mem>> -> memref<1x!tpu.dma_semaphore, #tpu.memory_space<semaphore_mem>>
    %11 = tpu.memref_squeeze %10 : memref<1x!tpu.dma_semaphore, #tpu.memory_space<semaphore_mem>> -> memref<!tpu.dma_semaphore, #tpu.memory_space<semaphore_mem>>
    tpu.enqueue_dma source(%8 : memref<1x32xf32, #tpu.memory_space<any>>) target(%9 : memref<1x32xf32, #tpu.memory_space<vmem>>) target_semaphore(%11 : memref<!tpu.dma_semaphore, #tpu.memory_space<semaphore_mem>>)
    %c1_i32 = arith.constant 1 : i32
    %12 = arith.addi %0, %c1_i32 : i32
    %13 = arith.index_cast %12 : i32 to index
    %14 = memref.load %arg1[%13] : memref<16xi32, #tpu.memory_space<smem>>
    %c0_i32_6 = arith.constant 0 : i32
    %15 = arith.cmpi slt, %14, %c0_i32_6 : i32
    %c0_i32_7 = arith.constant 0 : i32
    %16 = arith.select %15, %c0_i32_7, %14 : i32
    %c512_i32_8 = arith.constant 512 : i32
    %17 = arith.cmpi sge, %16, %c512_i32_8 : i32
    %c511_i32_9 = arith.constant 511 : i32
    %18 = arith.select %17, %c511_i32_9, %16 : i32
    %c1_i32_10 = arith.constant 1 : i32
    %c0_i32_11 = arith.constant 0 : i32
    %19 = tpu.memref_slice %arg2[%18, %c0_i32_11] : memref<512x32xf32, #tpu.memory_space<any>> -> memref<1x32xf32, #tpu.memory_space<any>>
    %c1_i32_12 = arith.constant 1 : i32
    %c0_i32_13 = arith.constant 0 : i32
    %20 = tpu.memref_slice %arg4[%c1_i32_12, %c0_i32_13] : memref<8x32xf32, #tpu.memory_space<vmem>> -> memref<1x32xf32, #tpu.memory_space<vmem>>
    %21 = tpu.memref_slice %arg5[%c1_i32_10] : memref<8x!tpu.dma_semaphore, #tpu.memory_space<semaphore_mem>> -> memref<1x!tpu.dma_semaphore, #tpu.memory_space<semaphore_mem>>
    %22 = tpu.memref_squeeze %21 : memref<1x!tpu.dma_semaphore, #tpu.memory_space<semaphore_mem>> -> memref<!tpu.dma_semaphore, #tpu.memory_space<semaphore_mem>>
    tpu.enqueue_dma source(%19 : memref<1x32xf32, #tpu.memory_space<any>>) target(%20 : memref<1x32xf32, #tpu.memory_space<vmem>>) target_semaphore(%22 : memref<!tpu.dma_semaphore, #tpu.memory_space<semaphore_mem>>)
    %c2_i32 = arith.constant 2 : i32
    %23 = arith.addi %0, %c2_i32 : i32
    %24 = arith.index_cast %23 : i32 to index
    %25 = memref.load %arg1[%24] : memref<16xi32, #tpu.memory_space<smem>>
    %c0_i32_14 = arith.constant 0 : i32
    %26 = arith.cmpi slt, %25, %c0_i32_14 : i32
    %c0_i32_15 = arith.constant 0 : i32
    %27 = arith.select %26, %c0_i32_15, %25 : i32
    %c512_i32_16 = arith.constant 512 : i32
    %28 = arith.cmpi sge, %27, %c512_i32_16 : i32
    %c511_i32_17 = arith.constant 511 : i32
    %29 = arith.select %28, %c511_i32_17, %27 : i32
    %c2_i32_18 = arith.constant 2 : i32
    %c0_i32_19 = arith.constant 0 : i32
    %30 = tpu.memref_slice %arg2[%29, %c0_i32_19] : memref<512x32xf32, #tpu.memory_space<any>> -> memref<1x32xf32, #tpu.memory_space<any>>
    %c2_i32_20 = arith.constant 2 : i32
    %c0_i32_21 = arith.constant 0 : i32
    %31 = tpu.memref_slice %arg4[%c2_i32_20, %c0_i32_21] : memref<8x32xf32, #tpu.memory_space<vmem>> -> memref<1x32xf32, #tpu.memory_space<vmem>>
    %32 = tpu.memref_slice %arg5[%c2_i32_18] : memref<8x!tpu.dma_semaphore, #tpu.memory_space<semaphore_mem>> -> memref<1x!tpu.dma_semaphore, #tpu.memory_space<semaphore_mem>>
    %33 = tpu.memref_squeeze %32 : memref<1x!tpu.dma_semaphore, #tpu.memory_space<semaphore_mem>> -> memref<!tpu.dma_semaphore, #tpu.memory_space<semaphore_mem>>
    tpu.enqueue_dma source(%30 : memref<1x32xf32, #tpu.memory_space<any>>) target(%31 : memref<1x32xf32, #tpu.memory_space<vmem>>) target_semaphore(%33 : memref<!tpu.dma_semaphore, #tpu.memory_space<semaphore_mem>>)
    %c3_i32 = arith.constant 3 : i32
    %34 = arith.addi %0, %c3_i32 : i32
    %35 = arith.index_cast %34 : i32 to index
    %36 = memref.load %arg1[%35] : memref<16xi32, #tpu.memory_space<smem>>
    %c0_i32_22 = arith.constant 0 : i32
    %37 = arith.cmpi slt, %36, %c0_i32_22 : i32
    %c0_i32_23 = arith.constant 0 : i32
    %38 = arith.select %37, %c0_i32_23, %36 : i32
    %c512_i32_24 = arith.constant 512 : i32
    %39 = arith.cmpi sge, %38, %c512_i32_24 : i32
    %c511_i32_25 = arith.constant 511 : i32
    %40 = arith.select %39, %c511_i32_25, %38 : i32
    %c3_i32_26 = arith.constant 3 : i32
    %c0_i32_27 = arith.constant 0 : i32
    %41 = tpu.memref_slice %arg2[%40, %c0_i32_27] : memref<512x32xf32, #tpu.memory_space<any>> -> memref<1x32xf32, #tpu.memory_space<any>>
    %c3_i32_28 = arith.constant 3 : i32
    %c0_i32_29 = arith.constant 0 : i32
    %42 = tpu.memref_slice %arg4[%c3_i32_28, %c0_i32_29] : memref<8x32xf32, #tpu.memory_space<vmem>> -> memref<1x32xf32, #tpu.memory_space<vmem>>
    %43 = tpu.memref_slice %arg5[%c3_i32_26] : memref<8x!tpu.dma_semaphore, #tpu.memory_space<semaphore_mem>> -> memref<1x!tpu.dma_semaphore, #tpu.memory_space<semaphore_mem>>
    %44 = tpu.memref_squeeze %43 : memref<1x!tpu.dma_semaphore, #tpu.memory_space<semaphore_mem>> -> memref<!tpu.dma_semaphore, #tpu.memory_space<semaphore_mem>>
    tpu.enqueue_dma source(%41 : memref<1x32xf32, #tpu.memory_space<any>>) target(%42 : memref<1x32xf32, #tpu.memory_space<vmem>>) target_semaphore(%44 : memref<!tpu.dma_semaphore, #tpu.memory_space<semaphore_mem>>)
    %c4_i32 = arith.constant 4 : i32
    %45 = arith.addi %0, %c4_i32 : i32
    %46 = arith.index_cast %45 : i32 to index
    %47 = memref.load %arg1[%46] : memref<16xi32, #tpu.memory_space<smem>>
    %c0_i32_30 = arith.constant 0 : i32
    %48 = arith.cmpi slt, %47, %c0_i32_30 : i32
    %c0_i32_31 = arith.constant 0 : i32
    %49 = arith.select %48, %c0_i32_31, %47 : i32
    %c512_i32_32 = arith.constant 512 : i32
    %50 = arith.cmpi sge, %49, %c512_i32_32 : i32
    %c511_i32_33 = arith.constant 511 : i32
    %51 = arith.select %50, %c511_i32_33, %49 : i32
    %c4_i32_34 = arith.constant 4 : i32
    %c0_i32_35 = arith.constant 0 : i32
    %52 = tpu.memref_slice %arg2[%51, %c0_i32_35] : memref<512x32xf32, #tpu.memory_space<any>> -> memref<1x32xf32, #tpu.memory_space<any>>
    %c4_i32_36 = arith.constant 4 : i32
    %c0_i32_37 = arith.constant 0 : i32
    %53 = tpu.memref_slice %arg4[%c4_i32_36, %c0_i32_37] : memref<8x32xf32, #tpu.memory_space<vmem>> -> memref<1x32xf32, #tpu.memory_space<vmem>>
    %54 = tpu.memref_slice %arg5[%c4_i32_34] : memref<8x!tpu.dma_semaphore, #tpu.memory_space<semaphore_mem>> -> memref<1x!tpu.dma_semaphore, #tpu.memory_space<semaphore_mem>>
    %55 = tpu.memref_squeeze %54 : memref<1x!tpu.dma_semaphore, #tpu.memory_space<semaphore_mem>> -> memref<!tpu.dma_semaphore, #tpu.memory_space<semaphore_mem>>
    tpu.enqueue_dma source(%52 : memref<1x32xf32, #tpu.memory_space<any>>) target(%53 : memref<1x32xf32, #tpu.memory_space<vmem>>) target_semaphore(%55 : memref<!tpu.dma_semaphore, #tpu.memory_space<semaphore_mem>>)
    %c5_i32 = arith.constant 5 : i32
    %56 = arith.addi %0, %c5_i32 : i32
    %57 = arith.index_cast %56 : i32 to index
    %58 = memref.load %arg1[%57] : memref<16xi32, #tpu.memory_space<smem>>
    %c0_i32_38 = arith.constant 0 : i32
    %59 = arith.cmpi slt, %58, %c0_i32_38 : i32
    %c0_i32_39 = arith.constant 0 : i32
    %60 = arith.select %59, %c0_i32_39, %58 : i32
    %c512_i32_40 = arith.constant 512 : i32
    %61 = arith.cmpi sge, %60, %c512_i32_40 : i32
    %c511_i32_41 = arith.constant 511 : i32
    %62 = arith.select %61, %c511_i32_41, %60 : i32
    %c5_i32_42 = arith.constant 5 : i32
    %c0_i32_43 = arith.constant 0 : i32
    %63 = tpu.memref_slice %arg2[%62, %c0_i32_43] : memref<512x32xf32, #tpu.memory_space<any>> -> memref<1x32xf32, #tpu.memory_space<any>>
    %c5_i32_44 = arith.constant 5 : i32
    %c0_i32_45 = arith.constant 0 : i32
    %64 = tpu.memref_slice %arg4[%c5_i32_44, %c0_i32_45] : memref<8x32xf32, #tpu.memory_space<vmem>> -> memref<1x32xf32, #tpu.memory_space<vmem>>
    %65 = tpu.memref_slice %arg5[%c5_i32_42] : memref<8x!tpu.dma_semaphore, #tpu.memory_space<semaphore_mem>> -> memref<1x!tpu.dma_semaphore, #tpu.memory_space<semaphore_mem>>
    %66 = tpu.memref_squeeze %65 : memref<1x!tpu.dma_semaphore, #tpu.memory_space<semaphore_mem>> -> memref<!tpu.dma_semaphore, #tpu.memory_space<semaphore_mem>>
    tpu.enqueue_dma source(%63 : memref<1x32xf32, #tpu.memory_space<any>>) target(%64 : memref<1x32xf32, #tpu.memory_space<vmem>>) target_semaphore(%66 : memref<!tpu.dma_semaphore, #tpu.memory_space<semaphore_mem>>)
    %c6_i32 = arith.constant 6 : i32
    %67 = arith.addi %0, %c6_i32 : i32
    %68 = arith.index_cast %67 : i32 to index
    %69 = memref.load %arg1[%68] : memref<16xi32, #tpu.memory_space<smem>>
    %c0_i32_46 = arith.constant 0 : i32
    %70 = arith.cmpi slt, %69, %c0_i32_46 : i32
    %c0_i32_47 = arith.constant 0 : i32
    %71 = arith.select %70, %c0_i32_47, %69 : i32
    %c512_i32_48 = arith.constant 512 : i32
    %72 = arith.cmpi sge, %71, %c512_i32_48 : i32
    %c511_i32_49 = arith.constant 511 : i32
    %73 = arith.select %72, %c511_i32_49, %71 : i32
    %c6_i32_50 = arith.constant 6 : i32
    %c0_i32_51 = arith.constant 0 : i32
    %74 = tpu.memref_slice %arg2[%73, %c0_i32_51] : memref<512x32xf32, #tpu.memory_space<any>> -> memref<1x32xf32, #tpu.memory_space<any>>
    %c6_i32_52 = arith.constant 6 : i32
    %c0_i32_53 = arith.constant 0 : i32
    %75 = tpu.memref_slice %arg4[%c6_i32_52, %c0_i32_53] : memref<8x32xf32, #tpu.memory_space<vmem>> -> memref<1x32xf32, #tpu.memory_space<vmem>>
    %76 = tpu.memref_slice %arg5[%c6_i32_50] : memref<8x!tpu.dma_semaphore, #tpu.memory_space<semaphore_mem>> -> memref<1x!tpu.dma_semaphore, #tpu.memory_space<semaphore_mem>>
    %77 = tpu.memref_squeeze %76 : memref<1x!tpu.dma_semaphore, #tpu.memory_space<semaphore_mem>> -> memref<!tpu.dma_semaphore, #tpu.memory_space<semaphore_mem>>
    tpu.enqueue_dma source(%74 : memref<1x32xf32, #tpu.memory_space<any>>) target(%75 : memref<1x32xf32, #tpu.memory_space<vmem>>) target_semaphore(%77 : memref<!tpu.dma_semaphore, #tpu.memory_space<semaphore_mem>>)
    %c7_i32 = arith.constant 7 : i32
    %78 = arith.addi %0, %c7_i32 : i32
    %79 = arith.index_cast %78 : i32 to index
    %80 = memref.load %arg1[%79] : memref<16xi32, #tpu.memory_space<smem>>
    %c0_i32_54 = arith.constant 0 : i32
    %81 = arith.cmpi slt, %80, %c0_i32_54 : i32
    %c0_i32_55 = arith.constant 0 : i32
    %82 = arith.select %81, %c0_i32_55, %80 : i32
    %c512_i32_56 = arith.constant 512 : i32
    %83 = arith.cmpi sge, %82, %c512_i32_56 : i32
    %c511_i32_57 = arith.constant 511 : i32
    %84 = arith.select %83, %c511_i32_57, %82 : i32
    %c7_i32_58 = arith.constant 7 : i32
    %c0_i32_59 = arith.constant 0 : i32
    %85 = tpu.memref_slice %arg2[%84, %c0_i32_59] : memref<512x32xf32, #tpu.memory_space<any>> -> memref<1x32xf32, #tpu.memory_space<any>>
    %c7_i32_60 = arith.constant 7 : i32
    %c0_i32_61 = arith.constant 0 : i32
    %86 = tpu.memref_slice %arg4[%c7_i32_60, %c0_i32_61] : memref<8x32xf32, #tpu.memory_space<vmem>> -> memref<1x32xf32, #tpu.memory_space<vmem>>
    %87 = tpu.memref_slice %arg5[%c7_i32_58] : memref<8x!tpu.dma_semaphore, #tpu.memory_space<semaphore_mem>> -> memref<1x!tpu.dma_semaphore, #tpu.memory_space<semaphore_mem>>
    %88 = tpu.memref_squeeze %87 : memref<1x!tpu.dma_semaphore, #tpu.memory_space<semaphore_mem>> -> memref<!tpu.dma_semaphore, #tpu.memory_space<semaphore_mem>>
    tpu.enqueue_dma source(%85 : memref<1x32xf32, #tpu.memory_space<any>>) target(%86 : memref<1x32xf32, #tpu.memory_space<vmem>>) target_semaphore(%88 : memref<!tpu.dma_semaphore, #tpu.memory_space<semaphore_mem>>)
    %c0_i32_62 = arith.constant 0 : i32
    %c0_i32_63 = arith.constant 0 : i32
    %89 = tpu.memref_slice %arg2[%7, %c0_i32_63] : memref<512x32xf32, #tpu.memory_space<any>> -> memref<1x32xf32, #tpu.memory_space<any>>
    %c0_i32_64 = arith.constant 0 : i32
    %c0_i32_65 = arith.constant 0 : i32
    %90 = tpu.memref_slice %arg4[%c0_i32_64, %c0_i32_65] : memref<8x32xf32, #tpu.memory_space<vmem>> -> memref<1x32xf32, #tpu.memory_space<vmem>>
    %91 = tpu.memref_slice %arg5[%c0_i32_62] : memref<8x!tpu.dma_semaphore, #tpu.memory_space<semaphore_mem>> -> memref<1x!tpu.dma_semaphore, #tpu.memory_space<semaphore_mem>>
    %92 = tpu.memref_squeeze %91 : memref<1x!tpu.dma_semaphore, #tpu.memory_space<semaphore_mem>> -> memref<!tpu.dma_semaphore, #tpu.memory_space<semaphore_mem>>
    tpu.wait_dma2 semaphore(%92 : memref<!tpu.dma_semaphore, #tpu.memory_space<semaphore_mem>>) src(%89 : memref<1x32xf32, #tpu.memory_space<any>>) dst(%90 : memref<1x32xf32, #tpu.memory_space<vmem>>)
    %c1_i32_66 = arith.constant 1 : i32
    %c0_i32_67 = arith.constant 0 : i32
    %93 = tpu.memref_slice %arg2[%18, %c0_i32_67] : memref<512x32xf32, #tpu.memory_space<any>> -> memref<1x32xf32, #tpu.memory_space<any>>
    %c1_i32_68 = arith.constant 1 : i32
    %c0_i32_69 = arith.constant 0 : i32
    %94 = tpu.memref_slice %arg4[%c1_i32_68, %c0_i32_69] : memref<8x32xf32, #tpu.memory_space<vmem>> -> memref<1x32xf32, #tpu.memory_space<vmem>>
    %95 = tpu.memref_slice %arg5[%c1_i32_66] : memref<8x!tpu.dma_semaphore, #tpu.memory_space<semaphore_mem>> -> memref<1x!tpu.dma_semaphore, #tpu.memory_space<semaphore_mem>>
    %96 = tpu.memref_squeeze %95 : memref<1x!tpu.dma_semaphore, #tpu.memory_space<semaphore_mem>> -> memref<!tpu.dma_semaphore, #tpu.memory_space<semaphore_mem>>
    tpu.wait_dma2 semaphore(%96 : memref<!tpu.dma_semaphore, #tpu.memory_space<semaphore_mem>>) src(%93 : memref<1x32xf32, #tpu.memory_space<any>>) dst(%94 : memref<1x32xf32, #tpu.memory_space<vmem>>)
    %c2_i32_70 = arith.constant 2 : i32
    %c0_i32_71 = arith.constant 0 : i32
    %97 = tpu.memref_slice %arg2[%29, %c0_i32_71] : memref<512x32xf32, #tpu.memory_space<any>> -> memref<1x32xf32, #tpu.memory_space<any>>
    %c2_i32_72 = arith.constant 2 : i32
    %c0_i32_73 = arith.constant 0 : i32
    %98 = tpu.memref_slice %arg4[%c2_i32_72, %c0_i32_73] : memref<8x32xf32, #tpu.memory_space<vmem>> -> memref<1x32xf32, #tpu.memory_space<vmem>>
    %99 = tpu.memref_slice %arg5[%c2_i32_70] : memref<8x!tpu.dma_semaphore, #tpu.memory_space<semaphore_mem>> -> memref<1x!tpu.dma_semaphore, #tpu.memory_space<semaphore_mem>>
    %100 = tpu.memref_squeeze %99 : memref<1x!tpu.dma_semaphore, #tpu.memory_space<semaphore_mem>> -> memref<!tpu.dma_semaphore, #tpu.memory_space<semaphore_mem>>
    tpu.wait_dma2 semaphore(%100 : memref<!tpu.dma_semaphore, #tpu.memory_space<semaphore_mem>>) src(%97 : memref<1x32xf32, #tpu.memory_space<any>>) dst(%98 : memref<1x32xf32, #tpu.memory_space<vmem>>)
    %c3_i32_74 = arith.constant 3 : i32
    %c0_i32_75 = arith.constant 0 : i32
    %101 = tpu.memref_slice %arg2[%40, %c0_i32_75] : memref<512x32xf32, #tpu.memory_space<any>> -> memref<1x32xf32, #tpu.memory_space<any>>
    %c3_i32_76 = arith.constant 3 : i32
    %c0_i32_77 = arith.constant 0 : i32
    %102 = tpu.memref_slice %arg4[%c3_i32_76, %c0_i32_77] : memref<8x32xf32, #tpu.memory_space<vmem>> -> memref<1x32xf32, #tpu.memory_space<vmem>>
    %103 = tpu.memref_slice %arg5[%c3_i32_74] : memref<8x!tpu.dma_semaphore, #tpu.memory_space<semaphore_mem>> -> memref<1x!tpu.dma_semaphore, #tpu.memory_space<semaphore_mem>>
    %104 = tpu.memref_squeeze %103 : memref<1x!tpu.dma_semaphore, #tpu.memory_space<semaphore_mem>> -> memref<!tpu.dma_semaphore, #tpu.memory_space<semaphore_mem>>
    tpu.wait_dma2 semaphore(%104 : memref<!tpu.dma_semaphore, #tpu.memory_space<semaphore_mem>>) src(%101 : memref<1x32xf32, #tpu.memory_space<any>>) dst(%102 : memref<1x32xf32, #tpu.memory_space<vmem>>)
    %c4_i32_78 = arith.constant 4 : i32
    %c0_i32_79 = arith.constant 0 : i32
    %105 = tpu.memref_slice %arg2[%51, %c0_i32_79] : memref<512x32xf32, #tpu.memory_space<any>> -> memref<1x32xf32, #tpu.memory_space<any>>
    %c4_i32_80 = arith.constant 4 : i32
    %c0_i32_81 = arith.constant 0 : i32
    %106 = tpu.memref_slice %arg4[%c4_i32_80, %c0_i32_81] : memref<8x32xf32, #tpu.memory_space<vmem>> -> memref<1x32xf32, #tpu.memory_space<vmem>>
    %107 = tpu.memref_slice %arg5[%c4_i32_78] : memref<8x!tpu.dma_semaphore, #tpu.memory_space<semaphore_mem>> -> memref<1x!tpu.dma_semaphore, #tpu.memory_space<semaphore_mem>>
    %108 = tpu.memref_squeeze %107 : memref<1x!tpu.dma_semaphore, #tpu.memory_space<semaphore_mem>> -> memref<!tpu.dma_semaphore, #tpu.memory_space<semaphore_mem>>
    tpu.wait_dma2 semaphore(%108 : memref<!tpu.dma_semaphore, #tpu.memory_space<semaphore_mem>>) src(%105 : memref<1x32xf32, #tpu.memory_space<any>>) dst(%106 : memref<1x32xf32, #tpu.memory_space<vmem>>)
    %c5_i32_82 = arith.constant 5 : i32
    %c0_i32_83 = arith.constant 0 : i32
    %109 = tpu.memref_slice %arg2[%62, %c0_i32_83] : memref<512x32xf32, #tpu.memory_space<any>> -> memref<1x32xf32, #tpu.memory_space<any>>
    %c5_i32_84 = arith.constant 5 : i32
    %c0_i32_85 = arith.constant 0 : i32
    %110 = tpu.memref_slice %arg4[%c5_i32_84, %c0_i32_85] : memref<8x32xf32, #tpu.memory_space<vmem>> -> memref<1x32xf32, #tpu.memory_space<vmem>>
    %111 = tpu.memref_slice %arg5[%c5_i32_82] : memref<8x!tpu.dma_semaphore, #tpu.memory_space<semaphore_mem>> -> memref<1x!tpu.dma_semaphore, #tpu.memory_space<semaphore_mem>>
    %112 = tpu.memref_squeeze %111 : memref<1x!tpu.dma_semaphore, #tpu.memory_space<semaphore_mem>> -> memref<!tpu.dma_semaphore, #tpu.memory_space<semaphore_mem>>
    tpu.wait_dma2 semaphore(%112 : memref<!tpu.dma_semaphore, #tpu.memory_space<semaphore_mem>>) src(%109 : memref<1x32xf32, #tpu.memory_space<any>>) dst(%110 : memref<1x32xf32, #tpu.memory_space<vmem>>)
    %c6_i32_86 = arith.constant 6 : i32
    %c0_i32_87 = arith.constant 0 : i32
    %113 = tpu.memref_slice %arg2[%73, %c0_i32_87] : memref<512x32xf32, #tpu.memory_space<any>> -> memref<1x32xf32, #tpu.memory_space<any>>
    %c6_i32_88 = arith.constant 6 : i32
    %c0_i32_89 = arith.constant 0 : i32
    %114 = tpu.memref_slice %arg4[%c6_i32_88, %c0_i32_89] : memref<8x32xf32, #tpu.memory_space<vmem>> -> memref<1x32xf32, #tpu.memory_space<vmem>>
    %115 = tpu.memref_slice %arg5[%c6_i32_86] : memref<8x!tpu.dma_semaphore, #tpu.memory_space<semaphore_mem>> -> memref<1x!tpu.dma_semaphore, #tpu.memory_space<semaphore_mem>>
    %116 = tpu.memref_squeeze %115 : memref<1x!tpu.dma_semaphore, #tpu.memory_space<semaphore_mem>> -> memref<!tpu.dma_semaphore, #tpu.memory_space<semaphore_mem>>
    tpu.wait_dma2 semaphore(%116 : memref<!tpu.dma_semaphore, #tpu.memory_space<semaphore_mem>>) src(%113 : memref<1x32xf32, #tpu.memory_space<any>>) dst(%114 : memref<1x32xf32, #tpu.memory_space<vmem>>)
    %c7_i32_90 = arith.constant 7 : i32
    %c0_i32_91 = arith.constant 0 : i32
    %117 = tpu.memref_slice %arg2[%84, %c0_i32_91] : memref<512x32xf32, #tpu.memory_space<any>> -> memref<1x32xf32, #tpu.memory_space<any>>
    %c7_i32_92 = arith.constant 7 : i32
    %c0_i32_93 = arith.constant 0 : i32
    %118 = tpu.memref_slice %arg4[%c7_i32_92, %c0_i32_93] : memref<8x32xf32, #tpu.memory_space<vmem>> -> memref<1x32xf32, #tpu.memory_space<vmem>>
    %119 = tpu.memref_slice %arg5[%c7_i32_90] : memref<8x!tpu.dma_semaphore, #tpu.memory_space<semaphore_mem>> -> memref<1x!tpu.dma_semaphore, #tpu.memory_space<semaphore_mem>>
    %120 = tpu.memref_squeeze %119 : memref<1x!tpu.dma_semaphore, #tpu.memory_space<semaphore_mem>> -> memref<!tpu.dma_semaphore, #tpu.memory_space<semaphore_mem>>
    tpu.wait_dma2 semaphore(%120 : memref<!tpu.dma_semaphore, #tpu.memory_space<semaphore_mem>>) src(%117 : memref<1x32xf32, #tpu.memory_space<any>>) dst(%118 : memref<1x32xf32, #tpu.memory_space<vmem>>)
    %c0 = arith.constant 0 : index
    %c0_94 = arith.constant 0 : index
    %121 = vector.load %arg4[%c0, %c0_94] : memref<8x32xf32, #tpu.memory_space<vmem>>, vector<8x32xf32>
    %cst = arith.constant 5.65685415 : f32
    %122 = vector.broadcast %cst : f32 to vector<8x32xf32>
    %123 = arith.mulf %121, %122 : vector<8x32xf32>
    %c0_95 = arith.constant 0 : index
    %c0_96 = arith.constant 0 : index
    %124 = vector.load %arg3[%c0_95, %c0_96] : memref<8x32xf32, #tpu.memory_space<vmem>>, vector<8x32xf32>
    tpu.vector_store %arg3[%c0_95, %c0_96], %123 {strides = array<i32>} : memref<8x32xf32, #tpu.memory_space<vmem>>, vector<8x32xf32>,
    return
  }
  func.func @transform_1(%arg0: i32, %arg1: memref<16xi32, #tpu.memory_space<smem>>) -> (i32, i32) {
    %c0_i32 = arith.constant 0 : i32
    %c0_i32_0 = arith.constant 0 : i32
    return %arg0, %c0_i32 : i32, i32
  }
}

</mosaic_0001>

<bundles_post_ra>
// kernel: tpu_custom_call.1
= control target key start
LH: loop header
LB: loop body
LE: loop exit
PB: predicated region body
PF: predicated region fallthrough
CT: control target
= control target key end

     0   :  { %s1010_s0 = inlined_call_operand.vmem [shape: s32[16], index: 0, kind: input, shape index: {}]   ;;  %s1011_s1 = inlined_call_operand.vmem [shape: f32[512,32], index: 1, kind: input, shape index: {}]   ;;  %s1012_s2 = inlined_call_operand.hbm [shape: f32[16,32], index: 2, kind: output, shape index: {}]  }
   0x1   :  { %s7_s11 = sshll.u32 %s1010_s0, 4  ;;  %s8_s11 = int_to_ptr.vmem [resolvable:$true] %s7_s11 }
   0x2   :  { %s777_s12 = scalar_lea.vmem %s8_s11, 16  ;;  %p782_p1 = scmp.lt.s32.totalorder %s8_s11, %s8_s11 }
   0x3   :  { %p778_p0 = scmp.ne.s32.totalorder %s8_s11, %s777_s12  ;;  %p783_p2 = scmp.lt.s32.totalorder %s777_s12, %s777_s12 }
   0x5   :  { %p784_p3 = por %p783_p2, %p782_p1 }
   0x7   :  { %p785_p4 = pnand %p784_p3, %p778_p0 }
   0x9   :  { %788 = shalt.err (!%p785_p4)  }
   0xa   :  { %s863_s13 = smov [#allocation5]  }
   0xb   :  { %10 = dma.vmem_to_smem %s8_s11, 16, %s863_s13, [#allocation4] }
   0xc   :  { %829 = dma.done.wait [#allocation4], 16 }
   0xd   :  { %830 = vsyncadd [#allocation4], 4294967280 }
   0xe   :  { %12 = sfence }
   0xf   :  { %13 = vsyncpa [#allocation7], 0 }
  0x10   :  { %15 = vsyncpa [#allocation7 + $0x1], 0  ;;  %s883_s14 = smov 0   ;;  %s885_s15 = smov 0  }
  0x11   :  { %s887_s0 = smov 0  }
  0x12 LB: > { %s704_s16 = sadd.s32 4294967295, %s861_s0   ;;  %s900_s17 = sadd.s32 1, %s861_s0   ;;  %s861_s0 = sphi %s887_s0, %s1017_s0   ;;  %s857_s15 = sphi %s885_s15, %s1016_s15   ;;  %s853_s14 = sphi %s883_s14, %s1015_s14  }
  0x13   : > { %s24_s18 = ssub.s32 %s861_s0, %s900_s17  ;;  %s27_s19 = sadd.s32 1, %s857_s15 }
  0x14   : > { %p25_p5 = scmp.eq.s32.totalorder %s24_s18, 0  ;;  %p705_p6 = scmp.ne.s32.totalorder %s24_s18, 0 }
  0x15   : > { %p31_p7 = scmp.eq.s32.totalorder %s861_s0, 1  ;;  %p36_p8 = scmp.ne.s32.totalorder %s857_s15, %s853_s14 }
  0x16   : > { %s909_s20 = scalar_select %p25_p5, %s857_s15, %s27_s19  }
  0x17   : > { %p911_p9 = por %p705_p6, %p31_p7  ;;  %p37_p10 = scmp.eq.s32.totalorder %s704_s16, 1 }
  0x18   : > { %p706_p12 = scmp.ge.s32.totalorder %s861_s0, 2 }
  0x19   : > { %p915_p11 = por %p37_p10, %p36_p8  ;;  %s51_s23 = sand.u32 (!%p706_p12), 1, %s857_s15  }
  0x1a   : > { %46 = sbr.rel (%p706_p12) target bundleno = 178 (0xb2), region = 12  ;;  %s922_s24 = sshll.u32 (!%p706_p12), %s861_s0, 3 }
  0x1b   : > { %s926_s25 = sshll.u32 (!%p706_p12), %s51_s23, 3  ;;  %s55_s26 = sld [smem:[#allocation5 + %s922_s24]] (!%p706_p12) }
  0x1c   : > { %s53_s30 = scalar_lea.vmem (!%p706_p12), [#allocation6], %s926_s25 }
  0x21   : > { %p56_p13 = scmp.lt.s32.totalorder %s55_s26, 0  ;;  %p710_p0 = scmp.ge.s32.totalorder %s55_s26, 512 }
  0x23   : > { %s1019_s26 = smov (%p56_p13, %s55_s26), 0 }
  0x24   : > { %s1021_s26 = smov (%p710_p0, %s1019_s26), 511 }
  0x25   : > { %s60_s29 = scalar_lea.vmem %s1011_s1, %s1021_s26 }
  0x26   : > { %v78_v0 = vld [vmem:[%s60_s29] sm:$0x1] }
  0x27   : > { %79 = vst [vmem:[#allocation2] sm:$0x1] %v78_v0 }
  0x28   : > { %104 = vsyncadd [#allocation3], 16  ;;  %s105_s3 = sadd.s32 1, %s922_s24 }
  0x29   : > { %s106_s4 = sld [smem:[#allocation5 + %s105_s3]] }
  0x2f   : > { %p107_p1 = scmp.lt.s32.totalorder %s106_s4, 0  ;;  %p713_p2 = scmp.ge.s32.totalorder %s106_s4, 512 }
  0x31   : > { %s1023_s4 = smov (%p107_p1, %s106_s4), 0 }
  0x32   : > { %s1025_s4 = smov (%p713_p2, %s1023_s4), 511 }
  0x33   : > { %s111_s7 = scalar_lea.vmem %s1011_s1, %s1025_s4 }
  0x34   : > { %v131_v1 = vld [vmem:[%s111_s7] sm:$0x1] }
  0x35   : > { %132 = vst [vmem:[#allocation2 + $0x1] sm:$0x1] %v131_v1 }
  0x36   : > { %157 = vsyncadd [#allocation3 + $0x1], 16  ;;  %s158_s8 = sadd.s32 2, %s922_s24 }
  0x37   : > { %s159_s9 = sld [smem:[#allocation5 + %s158_s8]] }
  0x3d   : > { %p160_p3 = scmp.lt.s32.totalorder %s159_s9, 0  ;;  %p716_p4 = scmp.ge.s32.totalorder %s159_s9, 512 }
  0x3f   : > { %s1027_s9 = smov (%p160_p3, %s159_s9), 0 }
  0x40   : > { %s1029_s9 = smov (%p716_p4, %s1027_s9), 511 }
  0x41   : > { %s164_s12 = scalar_lea.vmem %s1011_s1, %s1029_s9 }
  0x42   : > { %v184_v2 = vld [vmem:[%s164_s12] sm:$0x1] }
  0x43   : > { %185 = vst [vmem:[#allocation2 + $0x2] sm:$0x1] %v184_v2 }
  0x44   : > { %210 = vsyncadd [#allocation3 + $0x2], 16  ;;  %s211_s13 = sadd.s32 3, %s922_s24 }
  0x45   : > { %s212_s16 = sld [smem:[#allocation5 + %s211_s13]] }
  0x4b   : > { %p213_p5 = scmp.lt.s32.totalorder %s212_s16, 0  ;;  %p719_p6 = scmp.ge.s32.totalorder %s212_s16, 512 }
  0x4d   : > { %s1031_s16 = smov (%p213_p5, %s212_s16), 0 }
  0x4e   : > { %s1033_s16 = smov (%p719_p6, %s1031_s16), 511 }
  0x4f   : > { %s217_s26 = scalar_lea.vmem %s1011_s1, %s1033_s16 }
  0x50   : > { %v237_v3 = vld [vmem:[%s217_s26] sm:$0x1] }
  0x51   : > { %238 = vst [vmem:[#allocation2 + $0x3] sm:$0x1] %v237_v3 }
  0x52   : > { %263 = vsyncadd [#allocation3 + $0x3], 16  ;;  %s264_s27 = sadd.s32 4, %s922_s24 }
  0x53   : > { %s265_s28 = sld [smem:[#allocation5 + %s264_s27]] }
  0x59   : > { %p266_p7 = scmp.lt.s32.totalorder %s265_s28, 0  ;;  %p722_p8 = scmp.ge.s32.totalorder %s265_s28, 512 }
  0x5b   : > { %s1035_s28 = smov (%p266_p7, %s265_s28), 0 }
  0x5c   : > { %s1037_s28 = smov (%p722_p8, %s1035_s28), 511 }
  0x5d   : > { %s270_s4 = scalar_lea.vmem %s1011_s1, %s1037_s28 }
  0x5e   : > { %v290_v4 = vld [vmem:[%s270_s4] sm:$0x1] }
  0x5f   : > { %291 = vst [vmem:[#allocation2 + $0x4] sm:$0x1] %v290_v4 }
  0x60   : > { %316 = vsyncadd [#allocation3 + $0x4], 16  ;;  %s317_s5 = sadd.s32 5, %s922_s24 }
  0x61   : > { %s318_s6 = sld [smem:[#allocation5 + %s317_s5]] }
  0x67   : > { %p319_p10 = scmp.lt.s32.totalorder %s318_s6, 0  ;;  %p725_p12 = scmp.ge.s32.totalorder %s318_s6, 512 }
  0x69   : > { %s1039_s6 = smov (%p319_p10, %s318_s6), 0 }
  0x6a   : > { %s1041_s6 = smov (%p725_p12, %s1039_s6), 511 }
  0x6b   : > { %s323_s9 = scalar_lea.vmem %s1011_s1, %s1041_s6 }
  0x6c   : > { %v343_v5 = vld [vmem:[%s323_s9] sm:$0x1] }
  0x6d   : > { %344 = vst [vmem:[#allocation2 + $0x5] sm:$0x1] %v343_v5 }
  0x6e   : > { %369 = vsyncadd [#allocation3 + $0x5], 16  ;;  %s370_s10 = sadd.s32 6, %s922_s24 }
  0x6f   : > { %s371_s11 = sld [smem:[#allocation5 + %s370_s10]] }
  0x75   : > { %p372_p13 = scmp.lt.s32.totalorder %s371_s11, 0  ;;  %p728_p0 = scmp.ge.s32.totalorder %s371_s11, 512 }
  0x77   : > { %s1043_s11 = smov (%p372_p13, %s371_s11), 0 }
  0x78   : > { %s1045_s11 = smov (%p728_p0, %s1043_s11), 511 }
  0x79   : > { %s376_s16 = scalar_lea.vmem %s1011_s1, %s1045_s11 }
  0x7a   : > { %v396_v6 = vld [vmem:[%s376_s16] sm:$0x1] }
  0x7b   : > { %397 = vst [vmem:[#allocation2 + $0x6] sm:$0x1] %v396_v6 }
  0x7c   : > { %422 = vsyncadd [#allocation3 + $0x6], 16  ;;  %s423_s18 = sadd.s32 7, %s922_s24 }
  0x7d   : > { %s424_s19 = sld [smem:[#allocation5 + %s423_s18]] }
  0x83   : > { %p425_p1 = scmp.lt.s32.totalorder %s424_s19, 0  ;;  %p731_p2 = scmp.ge.s32.totalorder %s424_s19, 512 }
  0x85   : > { %s1047_s19 = smov (%p425_p1, %s424_s19), 0 }
  0x86   : > { %s1049_s19 = smov (%p731_p2, %s1047_s19), 511 }
  0x87   : > { %s429_s28 = scalar_lea.vmem %s1011_s1, %s1049_s19 }
  0x88   : > { %v449_v7 = vld [vmem:[%s429_s28] sm:$0x1] }
  0x89   : > { %450 = vst [vmem:[#allocation2 + $0x7] sm:$0x1] %v449_v7 }
  0x8a   : > { %475 = vsyncadd [#allocation3 + $0x7], 16 }
  0x8b   : > { %831 = dma.done.wait [#allocation3], 16 }
  0x8c   : > { %832 = vsyncadd [#allocation3], 4294967280 }
  0x8d   : > { %833 = dma.done.wait [#allocation3 + $0x1], 16 }
  0x8e   : > { %834 = vsyncadd [#allocation3 + $0x1], 4294967280 }
  0x8f   : > { %835 = dma.done.wait [#allocation3 + $0x2], 16 }
  0x90   : > { %836 = vsyncadd [#allocation3 + $0x2], 4294967280 }
  0x91   : > { %837 = dma.done.wait [#allocation3 + $0x3], 16 }
  0x92   : > { %838 = vsyncadd [#allocation3 + $0x3], 4294967280 }
  0x93   : > { %839 = dma.done.wait [#allocation3 + $0x4], 16 }
  0x94   : > { %840 = vsyncadd [#allocation3 + $0x4], 4294967280 }
  0x95   : > { %841 = dma.done.wait [#allocation3 + $0x5], 16 }
  0x96   : > { %842 = vsyncadd [#allocation3 + $0x5], 4294967280 }
  0x97   : > { %843 = dma.done.wait [#allocation3 + $0x6], 16 }
  0x98   : > { %844 = vsyncadd [#allocation3 + $0x6], 4294967280 }
  0x99   : > { %845 = dma.done.wait [#allocation3 + $0x7], 16 }
  0x9a   : > { %846 = vsyncadd [#allocation3 + $0x7], 4294967280  ;;  %s734_s24 = sshll.u32 %s861_s0, 7  ;;  %s511_s29 = sshll.u32 %s53_s30, 4  ;;  %v493_v8 = vld [vmem:[#allocation2] sm:$0xff]  ;;  %vm495_vm0 = vcmask 261120   ;;  %s969_s29 = int_to_ptr.vmem [resolvable:$true] %s511_s29 }
  0x9b   : > { %v494_v9 = vmul.f32 5.656854, %v493_v8  ;;  %s967_s5 = scalar_lea.hbm %s1012_s2, %s734_s24  ;;  %s498_s6 = scalar_lea.sflag [#allocation7], %s51_s23 }
  0x9c   : > { %s789_s7 = scalar_lea.vmem %s969_s29, 128  ;;  %s864_s8 = smov [#allocation6]  }
  0x9d   : > { %496 = vst.msk [vmem:[%s53_s30] sm:$0xff] %vm495_vm0, %v494_v9  ;;  %p790_p3 = scmp.ne.s32.totalorder %s969_s29, %s789_s7  ;;  %s793_s9 = sshll.u32 %s864_s8, 4  ;;  %s794_s9 = int_to_ptr.vmem [resolvable:$false] %s793_s9 }
  0x9e   : > { %s795_s10 = scalar_lea.vmem %s794_s9, 256  ;;  %p796_p6 = scmp.lt.s32.totalorder %s969_s29, %s794_s9 }
  0x9f   : > { %p791_p4 = pnand %p790_p3, %p911_p9  ;;  %p797_p7 = scmp.lt.s32.totalorder %s795_s10, %s789_s7 }
  0xa1   : > { %p792_p5 = pneg %p791_p4  ;;  %p798_p8 = por %p797_p7, %p796_p6 }
  0xa3   : > { %p799_p10 = pnand %p798_p8, %p792_p5 }
  0xa5   : > { %802 = shalt.err (!%p799_p10)
}
  0xa6   : > { %s803_s23 = scalar_lea.hbm %s967_s5, 128  ;;  %s807_s11 = scalar_lea.hbm %s1012_s2, 256 }
  0xa7   : > { %p804_p12 = scmp.ne.s32.totalorder %s967_s5, %s803_s23  ;;  %p808_p1 = scmp.lt.u32.totalorder %s967_s5, %s1012_s2 }
  0xa8   : > { %p809_p2 = scmp.lt.u32.totalorder %s807_s11, %s803_s23  ;;  %p811_p4 = scmp.lt.u32.totalorder %s803_s23, %s967_s5 }
  0xa9   : > { %p805_p13 = pnand %p804_p12, %p911_p9 }
  0xaa   : > { %p810_p3 = por %p809_p2, %p808_p1 }
  0xab   : > { %p806_p0 = pneg %p805_p13 }
  0xac   : > { %p812_p5 = por %p811_p4, %p810_p3 }
  0xae   : > { %p813_p6 = pnand %p812_p5, %p806_p0 }
  0xb0   : > { %816 = shalt.err (!%p813_p6)
}
  0xb1   : > { %745 = dma.vmem_to_hbm [thread:$0]  (%p911_p9), %s969_s29, 128, %s967_s5, %s498_s6  }
  0xb2 PF: > { %p751_p7 = scmp.ge.s32.totalorder %s861_s0, 1  ;;  %s523_s16 = sand.u32 1, %s853_s14  }
  0xb3   : > { %s524_s18 = scalar_lea.sflag [#allocation7], %s523_s16 }
  0xb4   : > { %p748_p8 = pnand %p751_p7, %p915_p11 }
  0xb6   : > { %848 = dma.done.wait (!%p748_p8), %s524_s18, 128  }
  0xb7   : > { %850 = vsyncadd (!%p748_p8), %s524_s18, 4294967168  ;;  %p18_p10 = scmp.ge.s32.totalorder %s900_s17, 3   ;;  %s1015_s14 = smov %s857_s15 }
  0xb8   : > { %s1016_s15 = smov %s909_s20  ;;  %s1017_s0 = smov %s900_s17 }
  0xb9   :  { %20 = sbr.rel (!%p18_p10) target bundleno = 18 (0x12), region = 393 }
  0xc0   :  { %529 = vsyncpa [#allocation7], 1 }
  0xc1   :  { %531 = vsyncpa [#allocation7 + $0x1], 1 }
  0xc2   :  { %532 = vsyncmov [#allocation3] }
  0xc5   :  { %s533_s0 = vpop.sfrf %532 }
  0xc6   :  { %p737_p9 = scmp.ne.s32.totalorder %s533_s0, 0 }
  0xc8   :  { %537 = shalt.err (%p737_p9)  }
  0xc9   :  { %539 = vsyncmov [#allocation3 + $0x1] }
  0xcc   :  { %s540_s21 = vpop.sfrf %539 }
  0xcd   :  { %p738_p11 = scmp.ne.s32.totalorder %s540_s21, 0 }
  0xcf   :  { %544 = shalt.err (%p738_p11)  }
  0xd0   :  { %546 = vsyncmov [#allocation3 + $0x2] }
  0xd3   :  { %s547_s22 = vpop.sfrf %546 }
  0xd4   :  { %p739_p12 = scmp.ne.s32.totalorder %s547_s22, 0 }
  0xd6   :  { %551 = shalt.err (%p739_p12)  }
  0xd7   :  { %553 = vsyncmov [#allocation3 + $0x3] }
  0xda   :  { %s554_s19 = vpop.sfrf %553 }
  0xdb   :  { %p740_p13 = scmp.ne.s32.totalorder %s554_s19, 0 }
  0xdd   :  { %558 = shalt.err (%p740_p13)  }
  0xde   :  { %560 = vsyncmov [#allocation3 + $0x4] }
  0xe1   :  { %s561_s17 = vpop.sfrf %560 }
  0xe2   :  { %p741_p0 = scmp.ne.s32.totalorder %s561_s17, 0 }
  0xe4   :  { %565 = shalt.err (%p741_p0)  }
  0xe5   :  { %567 = vsyncmov [#allocation3 + $0x5] }
  0xe8   :  { %s568_s1 = vpop.sfrf %567 }
  0xe9   :  { %p742_p1 = scmp.ne.s32.totalorder %s568_s1, 0 }
  0xeb   :  { %572 = shalt.err (%p742_p1)  }
  0xec   :  { %574 = vsyncmov [#allocation3 + $0x6] }
  0xef   :  { %s575_s2 = vpop.sfrf %574 }
  0xf0   :  { %p743_p2 = scmp.ne.s32.totalorder %s575_s2, 0 }
  0xf2   :  { %579 = shalt.err (%p743_p2)  }
  0xf3   :  { %581 = vsyncmov [#allocation3 + $0x7] }
  0xf6   :  { %s582_s14 = vpop.sfrf %581 }
  0xf7   :  { %p744_p3 = scmp.ne.s32.totalorder %s582_s14, 0 }
  0xf9   :  { %586 = shalt.err (%p744_p3)  }

</bundles_post_ra>
